<compile_context>
chip_gen: v6e
topology: v6e:2x2x1
jax: 0.10.0
libtpu: 0.0.40
codegen_flags: <defaults>
</compile_context>

<pallas_src>
import functools

import jax
import jax.numpy as jnp
from jax.experimental import pallas as pl


# --------------------------------------------------------------------------
# Fused Pallas kernel: input Linear+LeakyReLU -> RGCNConv -> RGCNConv -> Linear
# --------------------------------------------------------------------------
def _fused_rgcn_kernel(feat_ref, w_in_ref, b_in_ref, w_cat_ref, rg_bias_ref,
                       a_cat_ref, w_out_ref, b_out_ref, o_ref,
                       *, hidden, num_relations):
    H, R = hidden, num_relations

    # ---- input linear + LeakyReLU(0.01) ----
    x = (jnp.dot(feat_ref[...], w_in_ref[...], preferred_element_type=jnp.float32)
         + b_in_ref[...])
    x = jnp.where(x > 0, x, 0.01 * x)

    w_cat = w_cat_ref[...]        # (H, (R+1)*H)  = [W_root | W_1 | ... | W_R]
    a_cat = a_cat_ref[...]        # (N, R*N)      = [A_1 | ... | A_R]
    rg_bias = rg_bias_ref[...]    # (1, H)

    def rgcn_conv(xin):
        # one wide matmul: root projection + all relation projections
        msg = jnp.dot(xin, w_cat, preferred_element_type=jnp.float32)   # (N, (R+1)*H)
        root = msg[:, :H]
        # stack relation messages vertically -> (R*N, H), aggregate in one dot
        stacked = jnp.concatenate(
            [msg[:, (r + 1) * H:(r + 2) * H] for r in range(R)], axis=0)
        agg = jnp.dot(a_cat, stacked, preferred_element_type=jnp.float32)  # (N, H)
        return root + agg + rg_bias

    x = rgcn_conv(x)
    # F.dropout(p=0.3, training=False) -> identity at inference
    # TODO(synk): training-mode dropout (random mask + 1/(1-p) scaling) not emitted.
    x = rgcn_conv(x)

    # ---- output head into a lane-dense 128-wide padded slab ----
    o_ref[...] = (jnp.dot(x, w_out_ref[...], preferred_element_type=jnp.float32)
                  + b_out_ref[...])


# --------------------------------------------------------------------------
# Glue: normalized relation adjacency (plain JAX) + fused forward wrapper
# --------------------------------------------------------------------------
def build_relation_adjacency(edge_index, edge_type, num_nodes, num_relations):
    src, dst = edge_index[0], edge_index[1]
    adj = jnp.zeros((num_relations, num_nodes, num_nodes), jnp.float32)
    adj = adj.at[edge_type, dst, src].add(1.0)            # messages flow src -> dst
    deg = adj.sum(axis=2, keepdims=True)                  # per-relation in-degree
    adj = jnp.where(deg > 0, adj / jnp.maximum(deg, 1.0), 0.0)  # mean aggregation
    return adj


def rgcn_forward(params, feature, edge_index, edge_type, num_relations):
    n, emb = feature.shape
    hidden = params["w_in"].shape[1]
    out_dim = params["w_out"].shape[1]

    # Dense (R, N, N) adjacency path — only valid for small graphs.
    # TODO(synk): row-tile / scalar-prefetch edge-gather required before scaling N.
    assert n <= 1024, "dense adjacency path assumes a small graph"

    adj = build_relation_adjacency(edge_index, edge_type, n, num_relations)   # (R,N,N)
    # A_cat[:, r*N:(r+1)*N] = A_r
    a_cat = jnp.transpose(adj, (1, 0, 2)).reshape(n, num_relations * n)

    # W_cat = [W_root | W_1 | ... | W_R]  -> one wide projection matmul
    w_cat = jnp.concatenate(
        [params["rg_root"]] + [params["rg_rel"][r] for r in range(num_relations)],
        axis=1)

    # Pad the narrow (out_dim=3) head to 128 lanes for unmasked stores.
    out_pad = max(128, out_dim)
    w_out_p = jnp.zeros((hidden, out_pad), jnp.float32).at[:, :out_dim].set(params["w_out"])
    b_out_p = jnp.zeros((1, out_pad), jnp.float32).at[:, :out_dim].set(params["b_out"])

    kernel = functools.partial(_fused_rgcn_kernel,
                               hidden=hidden, num_relations=num_relations)

    def full(shape):
        return pl.BlockSpec(shape, lambda: tuple(0 for _ in shape))

    out = pl.pallas_call(
        kernel,
        out_shape=jax.ShapeDtypeStruct((n, out_pad), jnp.float32),
        in_specs=[
            full((n, emb)),                                   # feature
            full((emb, hidden)),                              # W_in
            full((1, hidden)),                                # b_in
            full((hidden, (num_relations + 1) * hidden)),     # [W_root | W_r...]
            full((1, hidden)),                                # rgcn bias
            full((n, num_relations * n)),                     # [A_r...]
            full((hidden, out_pad)),                          # W_out (padded)
            full((1, out_pad)),                               # b_out (padded)
        ],
        out_specs=full((n, out_pad)),
    )(feature.astype(jnp.float32),
      params["w_in"], params["b_in"].reshape(1, hidden),
      w_cat, params["rg_bias"].reshape(1, hidden),
      a_cat, w_out_p, b_out_p)

    return out[:, :out_dim]


# --------------------------------------------------------------------------
# Pure-JAX reference for sanity checking
# --------------------------------------------------------------------------
def rgcn_forward_ref(params, feature, edge_index, edge_type, num_relations):
    n = feature.shape[0]
    adj = build_relation_adjacency(edge_index, edge_type, n, num_relations)

    def conv(x):
        out = x @ params["rg_root"] + params["rg_bias"]
        for r in range(num_relations):
            out = out + adj[r] @ (x @ params["rg_rel"][r])
        return out

    y = feature.astype(jnp.float32) @ params["w_in"] + params["b_in"]
    y = jnp.where(y > 0, y, 0.01 * y)
    y = conv(y)
    y = conv(y)
    return y @ params["w_out"] + params["b_out"]


# --------------------------------------------------------------------------
if __name__ == "__main__":
    emb_dim, hidden, out_dim, num_rel = 16, 128, 3, 2
    n_nodes, n_edges = 16, 40

    key = jax.random.PRNGKey(0)
    ks = jax.random.split(key, 12)

    feature = jax.random.normal(ks[0], (n_nodes, emb_dim), jnp.float32)
    src = jax.random.randint(ks[1], (n_edges,), 0, n_nodes)
    dst = jax.random.randint(ks[2], (n_edges,), 0, n_nodes)
    edge_index = jnp.stack([src, dst], axis=0)              # (2, E)
    edge_type = jax.random.randint(ks[3], (n_edges,), 0, num_rel)

    # Deterministic synthetic parameters (rgcn2 / linear_relu_output1 exist in
    # __init__ but are unused by forward, so they are not materialized here).
    s = 0.1
    params = {
        "w_in": s * jax.random.normal(ks[4], (emb_dim, hidden), jnp.float32),
        "b_in": s * jax.random.normal(ks[5], (hidden,), jnp.float32),
        "rg_root": s * jax.random.normal(ks[6], (hidden, hidden), jnp.float32),
        "rg_rel": s * jax.random.normal(ks[7], (num_rel, hidden, hidden), jnp.float32),
        "rg_bias": s * jax.random.normal(ks[8], (hidden,), jnp.float32),
        "w_out": s * jax.random.normal(ks[9], (hidden, out_dim), jnp.float32),
        "b_out": s * jax.random.normal(ks[10], (out_dim,), jnp.float32),
    }

    out = rgcn_forward(params, feature, edge_index, edge_type, num_rel)
    out = jax.block_until_ready(out)

    ref = rgcn_forward_ref(params, feature, edge_index, edge_type, num_rel)
    assert out.shape == (n_nodes, out_dim)
    assert jnp.allclose(out, ref, rtol=2e-3, atol=2e-3), "mismatch vs reference"

    print("KERNEL_OK")
</pallas_src>

<mosaic_0001>
module attributes {stable_mosaic.version = 11 : i64} {
  func.func @_fused_rgcn_kernel(%arg0: memref<16x16xf32, #tpu.memory_space<vmem>>, %arg1: memref<16x128xf32, #tpu.memory_space<vmem>>, %arg2: memref<1x128xf32, #tpu.memory_space<vmem>>, %arg3: memref<128x384xf32, #tpu.memory_space<vmem>>, %arg4: memref<1x128xf32, #tpu.memory_space<vmem>>, %arg5: memref<16x32xf32, #tpu.memory_space<vmem>>, %arg6: memref<128x128xf32, #tpu.memory_space<vmem>>, %arg7: memref<1x128xf32, #tpu.memory_space<vmem>>, %arg8: memref<16x128xf32, #tpu.memory_space<vmem>>) attributes {dimension_semantics = [], scalar_prefetch = 0 : i64, scratch_operands = 0 : i64, tpu.core_type = #tpu.core_type<tc>} {
    %c0 = arith.constant 0 : index
    %c0_0 = arith.constant 0 : index
    %0 = vector.load %arg0[%c0, %c0_0] : memref<16x16xf32, #tpu.memory_space<vmem>>, vector<16x16xf32>
    %c0_1 = arith.constant 0 : index
    %c0_2 = arith.constant 0 : index
    %1 = vector.load %arg1[%c0_1, %c0_2] : memref<16x128xf32, #tpu.memory_space<vmem>>, vector<16x128xf32>
    %cst = arith.constant dense<0.000000e+00> : vector<16x128xf32>
    %2 = tpu.matmul %0, %1, %cst {dimension_numbers = #tpu.dot_dimension_numbers<[1], [0], [0], [1], [0, 0, 1, 1], [], []>} : vector<16x16xf32>, vector<16x128xf32>, vector<16x128xf32> -> vector<16x128xf32>
    %c0_3 = arith.constant 0 : index
    %c0_4 = arith.constant 0 : index
    %3 = vector.load %arg2[%c0_3, %c0_4] : memref<1x128xf32, #tpu.memory_space<vmem>>, vector<1x128xf32>
    %4 = vector.broadcast %3 : vector<1x128xf32> to vector<16x128xf32>
    %5 = arith.addf %2, %4 : vector<16x128xf32>
    %cst_5 = arith.constant 0.000000e+00 : f32
    %6 = vector.broadcast %cst_5 : f32 to vector<16x128xf32>
    %7 = arith.cmpf ogt, %5, %6 : vector<16x128xf32>
    %cst_6 = arith.constant 0.00999999977 : f32
    %8 = vector.broadcast %cst_6 : f32 to vector<16x128xf32>
    %9 = arith.mulf %8, %5 : vector<16x128xf32>
    %10 = arith.select %7, %5, %9 : vector<16x128xi1>, vector<16x128xf32>
    %c0_7 = arith.constant 0 : index
    %c0_8 = arith.constant 0 : index
    %11 = vector.load %arg3[%c0_7, %c0_8] : memref<128x384xf32, #tpu.memory_space<vmem>>, vector<128x384xf32>
    %c0_9 = arith.constant 0 : index
    %c0_10 = arith.constant 0 : index
    %12 = vector.load %arg5[%c0_9, %c0_10] : memref<16x32xf32, #tpu.memory_space<vmem>>, vector<16x32xf32>
    %c0_11 = arith.constant 0 : index
    %c0_12 = arith.constant 0 : index
    %13 = vector.load %arg4[%c0_11, %c0_12] : memref<1x128xf32, #tpu.memory_space<vmem>>, vector<1x128xf32>
    %cst_13 = arith.constant dense<0.000000e+00> : vector<16x384xf32>
    %14 = tpu.matmul %10, %11, %cst_13 {dimension_numbers = #tpu.dot_dimension_numbers<[1], [0], [0], [1], [0, 0, 1, 1], [], []>} : vector<16x128xf32>, vector<128x384xf32>, vector<16x384xf32> -> vector<16x384xf32>
    %15 = vector.extract_strided_slice %14 {offsets = [0, 0], sizes = [16, 128], strides = [1, 1]} : vector<16x384xf32> to vector<16x128xf32>
    %16 = vector.extract_strided_slice %14 {offsets = [0, 128], sizes = [16, 128], strides = [1, 1]} : vector<16x384xf32> to vector<16x128xf32>
    %17 = vector.extract_strided_slice %14 {offsets = [0, 256], sizes = [16, 128], strides = [1, 1]} : vector<16x384xf32> to vector<16x128xf32>
    %18 = tpu.concatenate %16, %17 in 0 : vector<16x128xf32>, vector<16x128xf32> -> vector<32x128xf32>
    %cst_14 = arith.constant dense<0.000000e+00> : vector<16x128xf32>
    %19 = tpu.matmul %12, %18, %cst_14 {dimension_numbers = #tpu.dot_dimension_numbers<[1], [0], [0], [1], [0, 0, 1, 1], [], []>} : vector<16x32xf32>, vector<32x128xf32>, vector<16x128xf32> -> vector<16x128xf32>
    %20 = arith.addf %15, %19 : vector<16x128xf32>
    %21 = vector.broadcast %13 : vector<1x128xf32> to vector<16x128xf32>
    %22 = arith.addf %20, %21 : vector<16x128xf32>
    %cst_15 = arith.constant dense<0.000000e+00> : vector<16x384xf32>
    %23 = tpu.matmul %22, %11, %cst_15 {dimension_numbers = #tpu.dot_dimension_numbers<[1], [0], [0], [1], [0, 0, 1, 1], [], []>} : vector<16x128xf32>, vector<128x384xf32>, vector<16x384xf32> -> vector<16x384xf32>
    %24 = vector.extract_strided_slice %23 {offsets = [0, 0], sizes = [16, 128], strides = [1, 1]} : vector<16x384xf32> to vector<16x128xf32>
    %25 = vector.extract_strided_slice %23 {offsets = [0, 128], sizes = [16, 128], strides = [1, 1]} : vector<16x384xf32> to vector<16x128xf32>
    %26 = vector.extract_strided_slice %23 {offsets = [0, 256], sizes = [16, 128], strides = [1, 1]} : vector<16x384xf32> to vector<16x128xf32>
    %27 = tpu.concatenate %25, %26 in 0 : vector<16x128xf32>, vector<16x128xf32> -> vector<32x128xf32>
    %cst_16 = arith.constant dense<0.000000e+00> : vector<16x128xf32>
    %28 = tpu.matmul %12, %27, %cst_16 {dimension_numbers = #tpu.dot_dimension_numbers<[1], [0], [0], [1], [0, 0, 1, 1], [], []>} : vector<16x32xf32>, vector<32x128xf32>, vector<16x128xf32> -> vector<16x128xf32>
    %29 = arith.addf %24, %28 : vector<16x128xf32>
    %30 = vector.broadcast %13 : vector<1x128xf32> to vector<16x128xf32>
    %31 = arith.addf %29, %30 : vector<16x128xf32>
    %c0_17 = arith.constant 0 : index
    %c0_18 = arith.constant 0 : index
    %32 = vector.load %arg6[%c0_17, %c0_18] : memref<128x128xf32, #tpu.memory_space<vmem>>, vector<128x128xf32>
    %cst_19 = arith.constant dense<0.000000e+00> : vector<16x128xf32>
    %33 = tpu.matmul %31, %32, %cst_19 {dimension_numbers = #tpu.dot_dimension_numbers<[1], [0], [0], [1], [0, 0, 1, 1], [], []>} : vector<16x128xf32>, vector<128x128xf32>, vector<16x128xf32> -> vector<16x128xf32>
    %c0_20 = arith.constant 0 : index
    %c0_21 = arith.constant 0 : index
    %34 = vector.load %arg7[%c0_20, %c0_21] : memref<1x128xf32, #tpu.memory_space<vmem>>, vector<1x128xf32>
    %35 = vector.broadcast %34 : vector<1x128xf32> to vector<16x128xf32>
    %36 = arith.addf %33, %35 : vector<16x128xf32>
    %c0_22 = arith.constant 0 : index
    %c0_23 = arith.constant 0 : index
    %37 = vector.load %arg8[%c0_22, %c0_23] : memref<16x128xf32, #tpu.memory_space<vmem>>, vector<16x128xf32>
    tpu.vector_store %arg8[%c0_22, %c0_23], %36 {strides = array<i32>} : memref<16x128xf32, #tpu.memory_space<vmem>>, vector<16x128xf32>,
    return
  }
}

</mosaic_0001>

<bundles_post_ra>
// kernel: tpu_custom_call.1
= control target key start
LH: loop header
LB: loop body
LE: loop exit
PB: predicated region body
PF: predicated region fallthrough
CT: control target
= control target key end

     0   :  { %13 = vsyncpa [#allocation3], 0  ;;  %s1522_s0 = inlined_call_operand.hbm [shape: f32[16,16], index: 0, kind: input, shape index: {}]   ;;  %s1523_s1 = inlined_call_operand.hbm [shape: f32[16,128], index: 1, kind: input, shape index: {}]   ;;  %s1524_s2 = inlined_call_operand.vmem [shape: f32[1,128], index: 2, kind: input, shape index: {}]   ;;  %s1525_s3 = inlined_call_operand.hbm [shape: f32[128,384], index: 3, kind: input, shape index: {}]   ;;  %s1526_s4 = inlined_call_operand.vmem [shape: f32[1,128], index: 4, kind: input, shape index: {}]   ;;  %s1527_s5 = inlined_call_operand.hbm [shape: f32[16,32], index: 5, kind: input, shape index: {}]   ;;  %s1528_s6 = inlined_call_operand.hbm [shape: f32[128,128], index: 6, kind: input, shape index: {}]   ;;  %s1529_s7 = inlined_call_operand.vmem [shape: f32[1,128], index: 7, kind: input, shape index: {}]   ;;  %s1530_s8 = inlined_call_operand.hbm [shape: f32[16,128], index: 8, kind: output, shape index: {}]  }
   0x1   :  { %14 = vsyncpa [#allocation6], 0 }
   0x2   :  { %15 = vsyncpa [#allocation9], 0 }
   0x3   :  { %16 = vsyncpa [#allocation4], 0  ;;  %s1194_s27 = smov [#allocation5]   ;;  %s1195_s29 = smov [#allocation8]  }
   0x4   :  { %s34_s28 = sshll.u32 %s1194_s27, 4  ;;  %s62_s30 = sshll.u32 %s1195_s29, 4  ;;  %s35_s28 = int_to_ptr.vmem [resolvable:$true] %s34_s28  ;;  %s63_s30 = int_to_ptr.vmem [resolvable:$true] %s62_s30 }
   0x5   :  { %s1074_s9 = scalar_lea.vmem %s35_s28, 256  ;;  %p1079_p1 = scmp.lt.s32.totalorder %s35_s28, %s35_s28 }
   0x6   :  { %p1075_p0 = scmp.ne.s32.totalorder %s35_s28, %s1074_s9  ;;  %p1080_p2 = scmp.lt.s32.totalorder %s1074_s9, %s1074_s9 }
   0x8   :  { %p1081_p3 = por %p1080_p2, %p1079_p1 }
   0xa   :  { %p1082_p4 = pnand %p1081_p3, %p1075_p0 }
   0xc   :  { %1085 = shalt.err (!%p1082_p4)
}
   0xd   :  { %s1196_s10 = smov 128   ;;  %s1197_s11 = smov 8  }
   0xe   :  { %40 = dma.hbm_to_vmem [thread:$0]  %s1523_s1, 256, %s35_s28, [#allocation6], %s1196_s10, %s1196_s10, %s1197_s11  }
   0xf   :  { %s1094_s14 = scalar_lea.vmem %s63_s30, 256  ;;  %p1099_p6 = scmp.lt.s32.totalorder %s63_s30, %s63_s30 }
  0x10   :  { %p1095_p5 = scmp.ne.s32.totalorder %s63_s30, %s1094_s14  ;;  %p1100_p7 = scmp.lt.s32.totalorder %s1094_s14, %s1094_s14 }
  0x12   :  { %p1101_p8 = por %p1100_p7, %p1099_p6 }
  0x14   :  { %p1102_p9 = pnand %p1101_p8, %p1095_p5 }
  0x16   :  { %1105 = shalt.err (!%p1102_p9)
}
  0x17   :  { %68 = dma.hbm_to_vmem [thread:$0]  %s1527_s5, 256, %s63_s30, [#allocation9], %s1196_s10, %s1196_s10, %s1197_s11  }
  0x18   :  { %s1198_s17 = smov [#allocation2]   ;;  %s1199_s19 = smov [#allocation7]  }
  0x19   :  { %s22_s18 = sshll.u32 %s1198_s17, 4  ;;  %s48_s20 = sshll.u32 %s1199_s19, 4  ;;  %s23_s18 = int_to_ptr.vmem [resolvable:$true] %s22_s18  ;;  %s49_s20 = int_to_ptr.vmem [resolvable:$true] %s48_s20 }
  0x1a   :  { %s1114_s1 = scalar_lea.vmem %s23_s18, 256  ;;  %p1119_p11 = scmp.lt.s32.totalorder %s23_s18, %s23_s18 }
  0x1b   :  { %p1115_p10 = scmp.ne.s32.totalorder %s23_s18, %s1114_s1  ;;  %p1120_p12 = scmp.lt.s32.totalorder %s1114_s1, %s1114_s1 }
  0x1d   :  { %p1121_p13 = por %p1120_p12, %p1119_p11 }
  0x1f   :  { %p1122_p0 = pnand %p1121_p13, %p1115_p10 }
  0x21   :  { %1125 = shalt.err (!%p1122_p0)
}
  0x22   :  { %28 = dma.hbm_to_vmem [thread:$0]  %s1522_s0, 256, %s23_s18, [#allocation3], %s1196_s10, %s1196_s10, %s1197_s11  }
  0x23   :  { %s1134_s5 = scalar_lea.vmem %s49_s20, 6144  ;;  %p1139_p2 = scmp.lt.s32.totalorder %s49_s20, %s49_s20 }
  0x24   :  { %p1135_p1 = scmp.ne.s32.totalorder %s49_s20, %s1134_s5  ;;  %p1140_p3 = scmp.lt.s32.totalorder %s1134_s5, %s1134_s5 }
  0x26   :  { %p1141_p4 = por %p1140_p3, %p1139_p2 }
  0x28   :  { %p1142_p5 = pnand %p1141_p4, %p1135_p1 }
  0x2a   :  { %1145 = shalt.err (!%p1142_p5)
}
  0x2b   :  { %s1200_s23 = smov 384   ;;  %s1201_s24 = smov 24  }
  0x2c   :  { %54 = dma.hbm_to_vmem [thread:$0]  %s1525_s3, 6144, %s49_s20, [#allocation6], %s1200_s23, %s1200_s23, %s1201_s24  }
  0x2d   :  { %s1202_s27 = smov [#allocation10]  }
  0x2e   :  { %s74_s28 = sshll.u32 %s1202_s27, 4  ;;  %s75_s28 = int_to_ptr.vmem [resolvable:$true] %s74_s28 }
  0x2f   :  { %s1154_s29 = scalar_lea.vmem %s75_s28, 2048  ;;  %p1159_p7 = scmp.lt.s32.totalorder %s75_s28, %s75_s28 }
  0x30   :  { %p1155_p6 = scmp.ne.s32.totalorder %s75_s28, %s1154_s29  ;;  %p1160_p8 = scmp.lt.s32.totalorder %s1154_s29, %s1154_s29 }
  0x32   :  { %p1161_p9 = por %p1160_p8, %p1159_p7 }
  0x34   :  { %p1162_p10 = pnand %p1161_p9, %p1155_p6 }
  0x36   :  { %1165 = shalt.err (!%p1162_p10)
}
  0x37   :  { %80 = dma.hbm_to_vmem [thread:$0]  %s1528_s6, 2048, %s75_s28, [#allocation9], %s1196_s10, %s1196_s10, %s1197_s11  }
  0x38   :  { %1186 = dma.done.wait [#allocation3], 256  }
  0x39   :  { %1187 = vsyncadd [#allocation3], 4294967040 }
  0x3a   :  { %1188 = dma.done.wait [#allocation6], 6400  }
  0x3b   :  { %1189 = vsyncadd [#allocation6], 4294960896 }
  0x3c   :  { %1190 = dma.done.wait [#allocation9], 2304  }
  0x3d   :  { %1191 = vsyncadd [#allocation9], 4294964992  ;;  %vm109_vm0 = vcmask 130048   ;;  %v101_v0 = vld [vmem:[#allocation5 + $0x8] sm:$0xff]  ;;  %v100_v1 = vld [vmem:[#allocation5] sm:$0xff]  ;;  %v1203_v52 = vmov 0.0  }
  0x3e   :  { %v98_v2 = vld [vmem:[#allocation2] sm:$0xff]  ;;  %921 = vmatprep.subr.mxu0 %v101_v0  ;;  %v1278_v3 = vld [vmem:[#allocation7 + $0x170] sm:$0xff]  ;;  %v1280_v4 = vld [vmem:[#allocation7 + $0x168] sm:$0xff]  ;;  %312 = vmatprep.mubr.f32.mxu1 %v1203_v52  ;;  %vm400_vm3 = vcmask 261120   ;;  %s1204_s13 = smov [#allocation11]  }
  0x3f   :  { %925 = vmatprep.mubr.msk.f32.mxu0 %vm109_vm0, %v98_v2  ;;  %922 = vmatpush3.msra.mxu0 %v101_v0  ;;  %v99_v5 = vld [vmem:[#allocation2 + $0x8] sm:$0xff]  ;;  %v1283_v6 = vld [vmem:[#allocation7 + $0x178] sm:$0xff]  ;;  %v1288_v8 = vld [vmem:[#allocation7 + $0x150] sm:$0xff]  ;;  %s828_s14 = sshll.u32 %s1204_s13, 4  ;;  %s829_s14 = int_to_ptr.vmem [resolvable:$true] %s828_s14 }
  0x40   :  { %248 = vmatprep.subr.mxu1 %v1278_v3  ;;  %v1285_v7 = vld [vmem:[#allocation7 + $0x158] sm:$0xff]  ;;  %923 = vmatprep.subr.mxu0 %v100_v1  ;;  %v1291_v9 = vld [vmem:[#allocation7 + $0x160] sm:$0xff]  ;;  %v1301_v12 = vld [vmem:[#allocation7 + $0x148] sm:$0xff]  ;;  %s1166_s15 = scalar_lea.vmem %s829_s14, 256  ;;  %p1171_p12 = scmp.lt.s32.totalorder %s829_s14, %s829_s14 }
  0x41   :  { %249 = vmatpush1.msra.mxu1 %v1280_v4  ;;  %924 = vmatpush3.msra.mxu0 %v100_v1  ;;  %v1293_v10 = vld [vmem:[#allocation7 + $0x140] sm:$0xff]  ;;  %v1297_v11 = vld [vmem:[#allocation7 + $0x138] sm:$0xff]  ;;  %v1303_v13 = vld [vmem:[#allocation7 + $0x128] sm:$0xff]  ;;  %p1167_p11 = scmp.ne.s32.totalorder %s829_s14, %s1166_s15  ;;  %p1172_p13 = scmp.lt.s32.totalorder %s1166_s15, %s1166_s15 }
  0x42   :  { %250 = vmatprep.subr.mxu1 %v1285_v7  ;;  %926 = vmatmul.mubr.msk.f32.vlgmr.msra.gmra.mxu0 %vm109_vm0, %v99_v5  ;;  %v1307_v14 = vld [vmem:[#allocation7 + $0x120] sm:$0xff]  ;;  %v1311_v15 = vld [vmem:[#allocation7 + $0x130] sm:$0xff]  ;;  %v1317_v17 = vld [vmem:[#allocation7 + $0x108] sm:$0xff] }
  0x43   :  { %928 = vmatprep.subr.mxu0 %v1283_v6  ;;  %251 = vmatpush1.msra.mxu1 %v1288_v8  ;;  %v1313_v16 = vld [vmem:[#allocation7 + $0x110] sm:$0xff]  ;;  %v1321_v18 = vld [vmem:[#allocation7 + $0x118] sm:$0xff]  ;;  %v1331_v21 = vld [vmem:[#allocation7 + $0x100] sm:$0xff]  ;;  %p1173_p0 = por %p1172_p13, %p1171_p12 }
  0x44   :  { %929 = vmatpush3.msra.mxu0 %v1283_v6  ;;  %252 = vmatprep.subr.mxu1 %v1293_v10  ;;  %v1323_v19 = vld [vmem:[#allocation7 + $0xf8] sm:$0xff]  ;;  %v1327_v20 = vld [vmem:[#allocation7 + $0xf0] sm:$0xff]  ;;  %v1333_v22 = vld [vmem:[#allocation7 + $0xe0] sm:$0xff] }
  0x45   :  { %930 = vmatprep.subr.mxu0 %v1291_v9  ;;  %253 = vmatpush1.msra.mxu1 %v1297_v11  ;;  %v1337_v23 = vld [vmem:[#allocation7 + $0xd8] sm:$0xff]  ;;  %v1341_v24 = vld [vmem:[#allocation7 + $0xe8] sm:$0xff]  ;;  %v1347_v26 = vld [vmem:[#allocation7 + $0xc0] sm:$0xff]  ;;  %p1174_p1 = pnand %p1173_p0, %p1167_p11 }
  0x46   :  { %931 = vmatpush3.msra.mxu0 %v1291_v9  ;;  %254 = vmatprep.subr.mxu1 %v1303_v13  ;;  %v1343_v25 = vld [vmem:[#allocation7 + $0xc8] sm:$0xff]  ;;  %v1351_v27 = vld [vmem:[#allocation7 + $0xd0] sm:$0xff]  ;;  %v1361_v30 = vld [vmem:[#allocation7 + $0xb8] sm:$0xff] }
  0x47   :  { %932 = vmatprep.subr.mxu0 %v1301_v12  ;;  %255 = vmatpush1.msra.mxu1 %v1307_v14  ;;  %v1353_v28 = vld [vmem:[#allocation7 + $0xb0] sm:$0xff]  ;;  %v1357_v29 = vld [vmem:[#allocation7 + $0xa8] sm:$0xff]  ;;  %v1363_v31 = vld [vmem:[#allocation7 + $0x98] sm:$0xff] }
  0x48   :  { %933 = vmatpush3.msra.mxu0 %v1301_v12  ;;  %256 = vmatprep.subr.mxu1 %v1313_v16  ;;  %v1367_v32 = vld [vmem:[#allocation7 + $0x90] sm:$0xff]  ;;  %v1371_v33 = vld [vmem:[#allocation7 + $0xa0] sm:$0xff]  ;;  %v1377_v35 = vld [vmem:[#allocation7 + $0x78] sm:$0xff] }
  0x49   :  { %934 = vmatprep.subr.mxu0 %v1311_v15  ;;  %257 = vmatpush1.msra.mxu1 %v1317_v17  ;;  %v1373_v34 = vld [vmem:[#allocation7 + $0x80] sm:$0xff]  ;;  %v1381_v36 = vld [vmem:[#allocation7 + $0x88] sm:$0xff]  ;;  %v1391_v39 = vld [vmem:[#allocation7 + $0x70] sm:$0xff] }
  0x4a   :  { %935 = vmatpush3.msra.mxu0 %v1311_v15  ;;  %258 = vmatprep.subr.mxu1 %v1323_v19  ;;  %v1383_v37 = vld [vmem:[#allocation7 + $0x68] sm:$0xff]  ;;  %v1387_v38 = vld [vmem:[#allocation7 + $0x60] sm:$0xff]  ;;  %v1399_v40 = vld [vmem:[#allocation7 + $0x50] sm:$0xff] }
  0x4b   :  { %936 = vmatprep.subr.mxu0 %v1321_v18  ;;  %259 = vmatpush1.msra.mxu1 %v1327_v20  ;;  %v1402_v41 = vld [vmem:[#allocation7 + $0x48] sm:$0xff]  ;;  %v1404_v42 = vld [vmem:[#allocation7 + $0x58] sm:$0xff]  ;;  %v1412_v44 = vld [vmem:[#allocation7 + $0x30] sm:$0xff] }
  0x4c   :  { %937 = vmatpush3.msra.mxu0 %v1321_v18  ;;  %260 = vmatprep.subr.mxu1 %v1333_v22  ;;  %v1408_v43 = vld [vmem:[#allocation7 + $0x38] sm:$0xff]  ;;  %v205_v45 = vld [vmem:[#allocation7 + $0x40] sm:$0xff]  ;;  %v202_v48 = vld [vmem:[#allocation7 + $0x28] sm:$0xff] }
  0x4d   :  { %938 = vmatprep.subr.mxu0 %v1331_v21  ;;  %261 = vmatpush1.msra.mxu1 %v1337_v23  ;;  %v1415_v46 = vld [vmem:[#allocation7 + $0x20] sm:$0xff]  ;;  %v1418_v47 = vld [vmem:[#allocation7 + $0x18] sm:$0xff]  ;;  %v1421_v49 = vld [vmem:[#allocation7 + $0x8] sm:$0xff] }
  0x4e   :  { %939 = vmatpush3.msra.mxu0 %v1331_v21  ;;  %262 = vmatprep.subr.mxu1 %v1343_v25  ;;  %v1423_v50 = vld [vmem:[#allocation7] sm:$0xff]  ;;  %v199_v51 = vld [vmem:[#allocation7 + $0x10] sm:$0xff] }
  0x4f   :  { %940 = vmatprep.subr.mxu0 %v1341_v24  ;;  %263 = vmatpush1.msra.mxu1 %v1347_v26  ;;  %v842_v53 = vld [vmem:[%s1524_s2] ss:$0 sm:$0xff] }
  0x50   :  { %941 = vmatpush3.msra.mxu0 %v1341_v24  ;;  %264 = vmatprep.subr.mxu1 %v1353_v28  ;;  %v1458_v62 = vld [vmem:[#allocation8] sm:$0xff] }
  0x51   :  { %942 = vmatprep.subr.mxu0 %v1351_v27  ;;  %265 = vmatpush1.msra.mxu1 %v1357_v29 }
  0x52   :  { %943 = vmatpush3.msra.mxu0 %v1351_v27  ;;  %266 = vmatprep.subr.mxu1 %v1363_v31 }
  0x53   :  { %944 = vmatprep.subr.mxu0 %v1361_v30  ;;  %267 = vmatpush1.msra.mxu1 %v1367_v32 }
  0x54   :  { %945 = vmatpush3.msra.mxu0 %v1361_v30  ;;  %268 = vmatprep.subr.mxu1 %v1373_v34 }
  0x55   :  { %946 = vmatprep.subr.mxu0 %v1371_v33  ;;  %269 = vmatpush1.msra.mxu1 %v1377_v35 }
  0x56   :  { %947 = vmatpush3.msra.mxu0 %v1371_v33  ;;  %270 = vmatprep.subr.mxu1 %v1383_v37 }
  0x57   :  { %948 = vmatprep.subr.mxu0 %v1381_v36  ;;  %271 = vmatpush1.msra.mxu1 %v1387_v38 }
  0x58   :  { %949 = vmatpush3.msra.mxu0 %v1381_v36  ;;  %272 = vmatprep.subr.mxu1 %v1399_v40 }
  0x59   :  { %950 = vmatprep.subr.mxu0 %v1391_v39  ;;  %273 = vmatpush1.msra.mxu1 %v1402_v41 }
  0x5a   :  { %951 = vmatpush3.msra.mxu0 %v1391_v39  ;;  %274 = vmatprep.subr.mxu1 %v1408_v43 }
  0x5b   :  { %952 = vmatprep.subr.mxu0 %v1404_v42  ;;  %275 = vmatpush1.msra.mxu1 %v1412_v44 }
  0x5c   :  { %953 = vmatpush3.msra.mxu0 %v1404_v42  ;;  %276 = vmatprep.subr.mxu1 %v1415_v46 }
  0x5d   :  { %954 = vmatprep.subr.mxu0 %v205_v45  ;;  %277 = vmatpush1.msra.mxu1 %v1418_v47 }
  0x5e   :  { %955 = vmatpush3.msra.mxu0 %v205_v45  ;;  %278 = vmatprep.subr.mxu1 %v1421_v49 }
  0x5f   :  { %956 = vmatprep.subr.mxu0 %v202_v48  ;;  %279 = vmatpush1.msra.mxu1 %v1423_v50 }
  0x60   :  { %957 = vmatpush3.msra.mxu0 %v202_v48  ;;  %974 = vmatprep.subr.mxu1 %v1283_v6 }
  0x61   :  { %958 = vmatprep.subr.mxu0 %v199_v51 }
  0x62   :  { %959 = vmatpush3.msra.mxu0 %v199_v51 }
 0x102   :  { %v927_v54 = vpop.f32.mrf.mxu0 }
 0x103   :  { %v188_v55 = vadd.f32 %v927_v54, %v842_v53 }
 0x104   :  { %v182_v56 = vpop.f32.mrf.mxu0 }
 0x105   :  { %v183_v57 = vadd.f32 %v842_v53, %v182_v56  ;;  %v194_v58 = vmul.f32 0.01, %v188_v55  ;;  %vm192_vm1 = vcmp.gt.f32.partialorder %v188_v55, 0.0 }
 0x107   :  { %v193_v59 = vmul.f32 0.01, %v183_v57  ;;  %vm191_vm2 = vcmp.gt.f32.partialorder %v183_v57, 0.0  ;;  %v196_v61 = vsel %vm192_vm1, %v188_v55, %v194_v58 }
 0x109   :  { %v195_v60 = vsel %vm191_vm2, %v183_v57, %v193_v59 }
 0x10a   :  { %313 = vmatmul.mubr.f32.vlgmr.msra.gmra.mxu1 %v195_v60  ;;  %960 = vmatprep.mubr.f32.mxu0 %v195_v60 }
 0x10b   :  { %961 = vmatmul.mubr.f32.vlgmr.msra.gmra.mxu0 %v196_v61  ;;  %318 = vmatprep.mubr.f32.mxu1 %v1203_v52 }
 0x10c   :  { %975 = vmatpush3.msra.mxu1 %v1283_v6  ;;  %971 = vmatprep.mubr.msk.f32.mxu0 %vm400_vm3, %v1458_v62 }
 0x10d   :  { %976 = vmatprep.subr.mxu1 %v1291_v9 }
 0x10e   :  { %319 = vmatmul.mubr.f32.gmra.mxu1 %v196_v61 }
 0x10f   :  { %977 = vmatpush3.msra.mxu1 %v1291_v9  ;;  %v1462_v9 = vld [vmem:[#allocation8 + $0x8] sm:$0xff] }
 0x110   :  { %978 = vmatprep.subr.mxu1 %v1301_v12 }
 0x111   :  { %979 = vmatpush3.msra.mxu1 %v1301_v12 }
 0x112   :  { %980 = vmatprep.subr.mxu1 %v1311_v15 }
 0x113   :  { %981 = vmatpush3.msra.mxu1 %v1311_v15  ;;  %v736_v15 = vld [vmem:[#allocation10 + $0x68] sm:$0xff] }
 0x114   :  { %982 = vmatprep.subr.mxu1 %v1321_v18 }
 0x115   :  { %983 = vmatpush3.msra.mxu1 %v1321_v18  ;;  %v733_v18 = vld [vmem:[#allocation10 + $0x50] sm:$0xff] }
 0x116   :  { %984 = vmatprep.subr.mxu1 %v1331_v21 }
 0x117   :  { %985 = vmatpush3.msra.mxu1 %v1331_v21  ;;  %v730_v21 = vld [vmem:[#allocation10 + $0x38] sm:$0xff] }
 0x118   :  { %986 = vmatprep.subr.mxu1 %v1341_v24 }
 0x119   :  { %987 = vmatpush3.msra.mxu1 %v1341_v24  ;;  %v727_v24 = vld [vmem:[#allocation10 + $0x20] sm:$0xff] }
 0x11a   :  { %988 = vmatprep.subr.mxu1 %v1351_v27 }
 0x11b   :  { %989 = vmatpush3.msra.mxu1 %v1351_v27 }
 0x11c   :  { %990 = vmatprep.subr.mxu1 %v1361_v30 }
 0x11d   :  { %991 = vmatpush3.msra.mxu1 %v1361_v30 }
 0x11e   :  { %992 = vmatprep.subr.mxu1 %v1371_v33 }
 0x11f   :  { %993 = vmatpush3.msra.mxu1 %v1371_v33  ;;  %v724_v33 = vld [vmem:[#allocation10 + $0x8] sm:$0xff] }
 0x120   :  { %994 = vmatprep.subr.mxu1 %v1381_v36 }
 0x121   :  { %995 = vmatpush3.msra.mxu1 %v1381_v36 }
 0x122   :  { %996 = vmatprep.subr.mxu1 %v1391_v39 }
 0x123   :  { %997 = vmatpush3.msra.mxu1 %v1391_v39 }
 0x124   :  { %998 = vmatprep.subr.mxu1 %v1404_v42 }
 0x125   :  { %999 = vmatpush3.msra.mxu1 %v1404_v42 }
 0x126   :  { %1000 = vmatprep.subr.mxu1 %v205_v45 }
 0x127   :  { %1001 = vmatpush3.msra.mxu1 %v205_v45 }
 0x128   :  { %1002 = vmatprep.subr.mxu1 %v202_v48 }
 0x129   :  { %1003 = vmatpush3.msra.mxu1 %v202_v48 }
 0x12a   :  { %1004 = vmatprep.subr.mxu1 %v199_v51 }
 0x12b   :  { %1005 = vmatpush3.msra.mxu1 %v199_v51 }
 0x1ca   :  { %v314_v63 = vpop.f32.mrf.mxu1 }
 0x1cb   :  { %v962_v0 = vpop.f32.mrf.mxu0 }
 0x1cc   :  { %v316_v1 = vpop.f32.mrf.mxu1  ;;  %963 = vmatprep.subr.mxu0 %v962_v0 }
 0x1cd   :  { %v391_v2 = vpop.f32.mrf.mxu0  ;;  %964 = vmatpush3.msra.mxu0 %v962_v0 }
 0x1ce   :  { %v320_v5 = vpop.f32.mrf.mxu1  ;;  %965 = vmatprep.subr.mxu0 %v391_v2 }
 0x1cf   :  { %966 = vmatpush3.msra.mxu0 %v391_v2 }
 0x1d0   :  { %v322_v6 = vpop.f32.mrf.mxu1 }
 0x1d1   :  { %967 = vmatprep.subr.mxu0 %v322_v6 }
 0x1d2   :  { %968 = vmatpush3.msra.mxu0 %v322_v6 }
 0x1d3   :  { %969 = vmatprep.subr.mxu0 %v316_v1 }
 0x1d4   :  { %970 = vmatpush3.msra.mxu0 %v316_v1 }
 0x1d5   :  { %972 = vmatmul.mubr.msk.f32.vlgmr.msra.gmra.mxu0 %vm400_vm3, %v1462_v9  ;;  %492 = vmatprep.subr.mxu0 %v1278_v3 }
 0x1d6   :  { %493 = vmatpush1.msra.mxu0 %v1280_v4  ;;  %556 = vmatprep.mubr.f32.mxu0 %v1203_v52 }
 0x1d7   :  { %494 = vmatprep.subr.mxu0 %v1285_v7 }
 0x1d8   :  { %495 = vmatpush1.msra.mxu0 %v1288_v8  ;;  %v1502_v8 = vld [vmem:[%s1526_s4] ss:$0 sm:$0xff] }
 0x1d9   :  { %496 = vmatprep.subr.mxu0 %v1293_v10 }
 0x1da   :  { %497 = vmatpush1.msra.mxu0 %v1297_v11 }
 0x1db   :  { %498 = vmatprep.subr.mxu0 %v1303_v13  ;;  %v738_v13 = vld [vmem:[#allocation10 + $0x78] sm:$0xff] }
 0x1dc   :  { %499 = vmatpush1.msra.mxu0 %v1307_v14  ;;  %v737_v14 = vld [vmem:[#allocation10 + $0x70] sm:$0xff]  ;;  %1020 = vmatprep.subr.mxu1 %v738_v13 }
 0x1dd   :  { %500 = vmatprep.subr.mxu0 %v1313_v16  ;;  %v735_v16 = vld [vmem:[#allocation10 + $0x60] sm:$0xff] }
 0x1de   :  { %501 = vmatpush1.msra.mxu0 %v1317_v17  ;;  %v734_v17 = vld [vmem:[#allocation10 + $0x58] sm:$0xff] }
 0x1df   :  { %502 = vmatprep.subr.mxu0 %v1323_v19  ;;  %v732_v19 = vld [vmem:[#allocation10 + $0x48] sm:$0xff] }
 0x1e0   :  { %503 = vmatpush1.msra.mxu0 %v1327_v20  ;;  %v731_v20 = vld [vmem:[#allocation10 + $0x40] sm:$0xff] }
 0x1e1   :  { %504 = vmatprep.subr.mxu0 %v1333_v22  ;;  %v729_v22 = vld [vmem:[#allocation10 + $0x30] sm:$0xff] }
 0x1e2   :  { %505 = vmatpush1.msra.mxu0 %v1337_v23  ;;  %v728_v23 = vld [vmem:[#allocation10 + $0x28] sm:$0xff] }
 0x1e3   :  { %506 = vmatprep.subr.mxu0 %v1343_v25 }
 0x1e4   :  { %507 = vmatpush1.msra.mxu0 %v1347_v26 }
 0x1e5   :  { %508 = vmatprep.subr.mxu0 %v1353_v28 }
 0x1e6   :  { %509 = vmatpush1.msra.mxu0 %v1357_v29 }
 0x1e7   :  { %510 = vmatprep.subr.mxu0 %v1363_v31  ;;  %v726_v31 = vld [vmem:[#allocation10 + $0x18] sm:$0xff] }
 0x1e8   :  { %511 = vmatpush1.msra.mxu0 %v1367_v32  ;;  %v725_v32 = vld [vmem:[#allocation10 + $0x10] sm:$0xff] }
 0x1e9   :  { %512 = vmatprep.subr.mxu0 %v1373_v34  ;;  %v723_v34 = vld [vmem:[#allocation10] sm:$0xff] }
 0x1ea   :  { %513 = vmatpush1.msra.mxu0 %v1377_v35 }
 0x1eb   :  { %514 = vmatprep.subr.mxu0 %v1383_v37 }
 0x1ec   :  { %515 = vmatpush1.msra.mxu0 %v1387_v38 }
 0x1ed   :  { %516 = vmatprep.subr.mxu0 %v1399_v40 }
 0x1ee   :  { %517 = vmatpush1.msra.mxu0 %v1402_v41  ;;  %v850_v41 = vld [vmem:[%s1529_s7] ss:$0 sm:$0xff] }
 0x1ef   :  { %518 = vmatprep.subr.mxu0 %v1408_v43 }
 0x1f0   :  { %519 = vmatpush1.msra.mxu0 %v1412_v44 }
 0x1f1   :  { %520 = vmatprep.subr.mxu0 %v1415_v46 }
 0x1f2   :  { %521 = vmatpush1.msra.mxu0 %v1418_v47 }
 0x1f3   :  { %522 = vmatprep.subr.mxu0 %v1421_v49 }
 0x1f4   :  { %523 = vmatpush1.msra.mxu0 %v1423_v50 }
 0x295   :  { %v973_v3 = vpop.f32.mrf.mxu0 }
 0x296   :  { %v483_v4 = vadd.f32 %v973_v3, %v320_v5 }
 0x297   :  { %v473_v7 = vpop.f32.mrf.mxu0 }
 0x298   :  { %v482_v10 = vadd.f32 %v473_v7, %v314_v63  ;;  %v491_v12 = vadd.f32 %v1502_v8, %v483_v4 }
 0x29a   :  { %v490_v11 = vadd.f32 %v1502_v8, %v482_v10 }
 0x29c   :  { %557 = vmatmul.mubr.f32.vlgmr.msra.gmra.mxu0 %v490_v11  ;;  %1006 = vmatprep.mubr.f32.mxu1 %v490_v11 }
 0x29d   :  { %1007 = vmatmul.mubr.f32.vlgmr.msra.gmra.mxu1 %v491_v12  ;;  %562 = vmatprep.mubr.f32.mxu0 %v1203_v52 }
 0x29e   :  { %1021 = vmatpush3.msra.mxu1 %v738_v13 }
 0x29f   :  { %1022 = vmatprep.subr.mxu1 %v737_v14 }
 0x2a0   :  { %563 = vmatmul.mubr.f32.gmra.mxu0 %v491_v12  ;;  %1023 = vmatpush3.msra.mxu1 %v737_v14 }
 0x2a1   :  { %1017 = vmatprep.mubr.msk.f32.mxu0 %vm400_vm3, %v1458_v62  ;;  %1024 = vmatprep.subr.mxu1 %v736_v15 }
 0x2a2   :  { %1025 = vmatpush3.msra.mxu1 %v736_v15 }
 0x2a3   :  { %1026 = vmatprep.subr.mxu1 %v735_v16 }
 0x2a4   :  { %1027 = vmatpush3.msra.mxu1 %v735_v16 }
 0x2a5   :  { %1028 = vmatprep.subr.mxu1 %v734_v17 }
 0x2a6   :  { %1029 = vmatpush3.msra.mxu1 %v734_v17 }
 0x2a7   :  { %1030 = vmatprep.subr.mxu1 %v733_v18 }
 0x2a8   :  { %1031 = vmatpush3.msra.mxu1 %v733_v18 }
 0x2a9   :  { %1032 = vmatprep.subr.mxu1 %v732_v19 }
 0x2aa   :  { %1033 = vmatpush3.msra.mxu1 %v732_v19 }
 0x2ab   :  { %1034 = vmatprep.subr.mxu1 %v731_v20 }
 0x2ac   :  { %1035 = vmatpush3.msra.mxu1 %v731_v20 }
 0x2ad   :  { %1036 = vmatprep.subr.mxu1 %v730_v21 }
 0x2ae   :  { %1037 = vmatpush3.msra.mxu1 %v730_v21 }
 0x2af   :  { %1038 = vmatprep.subr.mxu1 %v729_v22 }
 0x2b0   :  { %1039 = vmatpush3.msra.mxu1 %v729_v22 }
 0x2b1   :  { %1040 = vmatprep.subr.mxu1 %v728_v23 }
 0x2b2   :  { %1041 = vmatpush3.msra.mxu1 %v728_v23 }
 0x2b3   :  { %1042 = vmatprep.subr.mxu1 %v727_v24 }
 0x2b4   :  { %1043 = vmatpush3.msra.mxu1 %v727_v24 }
 0x2b5   :  { %1044 = vmatprep.subr.mxu1 %v726_v31 }
 0x2b6   :  { %1045 = vmatpush3.msra.mxu1 %v726_v31 }
 0x2b7   :  { %1046 = vmatprep.subr.mxu1 %v725_v32 }
 0x2b8   :  { %1047 = vmatpush3.msra.mxu1 %v725_v32 }
 0x2b9   :  { %1048 = vmatprep.subr.mxu1 %v724_v33 }
 0x2ba   :  { %1049 = vmatpush3.msra.mxu1 %v724_v33 }
 0x2bb   :  { %1050 = vmatprep.subr.mxu1 %v723_v34 }
 0x2bc   :  { %1051 = vmatpush3.msra.mxu1 %v723_v34 }
 0x35c   :  { %v558_v25 = vpop.f32.mrf.mxu0 }
 0x35d   :  { %v1008_v26 = vpop.f32.mrf.mxu1 }
 0x35e   :  { %v560_v27 = vpop.f32.mrf.mxu0  ;;  %1009 = vmatprep.subr.mxu0 %v1008_v26 }
 0x35f   :  { %v635_v28 = vpop.f32.mrf.mxu1  ;;  %1010 = vmatpush3.msra.mxu0 %v1008_v26 }
 0x360   :  { %v564_v29 = vpop.f32.mrf.mxu0  ;;  %1011 = vmatprep.subr.mxu0 %v635_v28 }
 0x361   :  { %1012 = vmatpush3.msra.mxu0 %v635_v28 }
 0x362   :  { %v566_v30 = vpop.f32.mrf.mxu0 }
 0x363   :  { %1013 = vmatprep.subr.mxu0 %v566_v30 }
 0x364   :  { %1014 = vmatpush3.msra.mxu0 %v566_v30 }
 0x365   :  { %1015 = vmatprep.subr.mxu0 %v560_v27 }
 0x366   :  { %1016 = vmatpush3.msra.mxu0 %v560_v27 }
 0x367   :  { %1018 = vmatmul.mubr.msk.f32.vlgmr.msra.gmra.mxu0 %vm400_vm3, %v1462_v9 }
 0x427   :  { %v1019_v35 = vpop.f32.mrf.mxu0 }
 0x428   :  { %v720_v36 = vadd.f32 %v1019_v35, %v564_v29 }
 0x429   :  { %v710_v37 = vpop.f32.mrf.mxu0 }
 0x42a   :  { %v719_v38 = vadd.f32 %v710_v37, %v558_v25  ;;  %v722_v40 = vadd.f32 %v1502_v8, %v720_v36 }
 0x42c   :  { %v721_v39 = vadd.f32 %v1502_v8, %v719_v38 }
 0x42e   :  { %1052 = vmatprep.mubr.f32.mxu1 %v721_v39 }
 0x42f   :  { %1053 = vmatmul.mubr.f32.vlgmr.msra.gmra.mxu1 %v722_v40 }
 0x4ef   :  { %v1054_v42 = vpop.f32.mrf.mxu1 }
 0x4f0   :  { %v818_v43 = vadd.f32 %v1054_v42, %v850_v41 }
 0x4f1   :  { %v812_v44 = vpop.f32.mrf.mxu1 }
 0x4f2   :  { %822 = vst [vmem:[#allocation11 + $0x8] sm:$0xff] %v818_v43  ;;  %v813_v45 = vadd.f32 %v850_v41, %v812_v44 }
 0x4f4   :  { %821 = vst [vmem:[#allocation11] sm:$0xff] %v813_v45 }
 0x4f5   :  { %1177 = shalt.err (!%p1174_p1)
}
 0x4f6   :  { %834 = dma.vmem_to_hbm [thread:$0]  %s829_s14, 256, %s1530_s8, [#allocation4], %s1196_s10, %s1196_s10, %s1197_s11  }
 0x4f7   :  { %1192 = dma.done.wait [#allocation4], 256  }
 0x4f8   :  { %1193 = vsyncadd [#allocation4], 4294967040 }
 0x4f9   :  { %838 = vsyncpa [#allocation3], 1 }
 0x4fa   :  { %839 = vsyncpa [#allocation6], 1 }
 0x4fb   :  { %840 = vsyncpa [#allocation9], 1 }
 0x4fc   :  { %841 = vsyncpa [#allocation4], 1 }

</bundles_post_ra>
